<compile_context>
chip_gen: v7x
topology: tpu7x:2x2x1
jax: 0.10.0
libtpu: 0.0.40
codegen_flags: <defaults>
</compile_context>

<pallas_src>
import functools

import jax
import jax.numpy as jnp
from jax.experimental import pallas as pl
from jax.experimental.pallas import tpu as pltpu


def _round_up(n: int, m: int) -> int:
    return ((n + m - 1) // m) * m


def mlp_kernel(x_ref, w1_ref, b1_ref, w2_ref, b2_ref, w3_ref, b3_ref, o_ref):
    # Whole hot path (3 matmuls + biases + sigmoids) runs in VMEM on the MXU/VPU/EUP.
    # Matmul operands are bf16; accumulation, bias add and sigmoid are f32.
    x = x_ref[...]                                                     # (TB, 896) bf16
    h1 = jnp.dot(x, w1_ref[...], preferred_element_type=jnp.float32)   # (TB, 256) f32
    h1 = jax.nn.sigmoid(h1 + b1_ref[...])
    h2 = jnp.dot(h1.astype(jnp.bfloat16), w2_ref[...],
                 preferred_element_type=jnp.float32)                   # (TB, 64) f32
    h2 = jax.nn.sigmoid(h2 + b2_ref[...])
    o = jnp.dot(h2.astype(jnp.bfloat16), w3_ref[...],
                preferred_element_type=jnp.float32) + b3_ref[...]      # (TB, 128) f32
    o_ref[...] = o.astype(o_ref.dtype)


@functools.partial(jax.jit, static_argnames=("block_b",))
def simple_net_forward(x, w1, b1, w2, b2, w3, b3, block_b=512):
    """Forward pass of SimpleNet.  x: (B, 784) f32.  Weights stored (in, out)."""
    B, D_in = x.shape
    D_h1 = w1.shape[1]          # 256
    D_h2 = w2.shape[1]          # 64
    D_out = w3.shape[1]         # 10

    # Lane-dense padding of the ragged dims (multiples of 128 lanes).
    D_in_p = _round_up(D_in, 128)      # 784 -> 896
    D_out_p = _round_up(D_out, 128)    # 10  -> 128

    # Batch tile: at most block_b, at least a multiple of 16 sublanes (bf16 packing).
    bb = min(block_b, _round_up(B, 16))
    B_p = _round_up(B, bb)
    grid = (B_p // bb,)

    bf16 = jnp.bfloat16
    # Zero-pad + cast matmul operands once in HBM; biases stay f32.
    x_p = jnp.zeros((B_p, D_in_p), bf16).at[:B, :D_in].set(x.astype(bf16))
    w1_p = jnp.zeros((D_in_p, D_h1), bf16).at[:D_in, :].set(w1.astype(bf16))
    w2_p = w2.astype(bf16)
    w3_p = jnp.zeros((D_h2, D_out_p), bf16).at[:, :D_out].set(w3.astype(bf16))
    b1_p = b1.astype(jnp.float32)
    b2_p = b2.astype(jnp.float32)
    b3_p = jnp.zeros((1, D_out_p), jnp.float32).at[:, :D_out].set(b3.astype(jnp.float32))

    # Weights/biases (~0.5 MiB bf16) stay fully VMEM-resident; only the batch axis is tiled.
    in_specs = [
        pl.BlockSpec((bb, D_in_p), lambda i: (i, 0)),       # x tile
        pl.BlockSpec((D_in_p, D_h1), lambda i: (0, 0)),     # w1 (896, 256)
        pl.BlockSpec((1, D_h1), lambda i: (0, 0)),          # b1 (1, 256)
        pl.BlockSpec((D_h1, D_h2), lambda i: (0, 0)),       # w2 (256, 64)
        pl.BlockSpec((1, D_h2), lambda i: (0, 0)),          # b2 (1, 64)
        pl.BlockSpec((D_h2, D_out_p), lambda i: (0, 0)),    # w3 (64, 128)
        pl.BlockSpec((1, D_out_p), lambda i: (0, 0)),       # b3 (1, 128)
    ]
    out_specs = pl.BlockSpec((bb, D_out_p), lambda i: (i, 0))

    flops = 2 * B_p * (D_in_p * D_h1 + D_h1 * D_h2 + D_h2 * D_out_p)
    bytes_accessed = (
        B_p * D_in_p * 2                     # x (bf16)
        + (D_in_p * D_h1 + D_h1 * D_h2 + D_h2 * D_out_p) * 2   # weights (bf16)
        + (D_h1 + D_h2 + D_out_p) * 4        # biases (f32)
        + B_p * D_out_p * 4                  # output (f32)
    )

    out = pl.pallas_call(
        mlp_kernel,
        out_shape=jax.ShapeDtypeStruct((B_p, D_out_p), jnp.float32),
        grid_spec=pltpu.PrefetchScalarGridSpec(
            num_scalar_prefetch=0,
            grid=grid,
            in_specs=in_specs,
            out_specs=out_specs,
        ),
        compiler_params=pltpu.CompilerParams(
            dimension_semantics=("parallel",),
        ),
        cost_estimate=pl.CostEstimate(
            flops=flops,
            transcendentals=B_p * (D_h1 + D_h2),   # sigmoid -> exp on EUP
            bytes_accessed=bytes_accessed,
        ),
    )(x_p, w1_p, b1_p, w2_p, b2_p, w3_p, b3_p)

    # Strip batch and output-lane padding.
    return out[:B, :D_out]


def init_linear_params(key, fan_in, fan_out):
    # Mimics PyTorch nn.Linear default init: U(-1/sqrt(fan_in), 1/sqrt(fan_in)).
    kw, kb = jax.random.split(key)
    bound = 1.0 / jnp.sqrt(jnp.float32(fan_in))
    # stored as (in, out) so the kernel computes x @ W  (== PyTorch x @ W.T with W (out,in))
    w = jax.random.uniform(kw, (fan_in, fan_out), jnp.float32, -bound, bound)
    b = jax.random.uniform(kb, (1, fan_out), jnp.float32, -bound, bound)
    return w, b


def reference_forward(x, w1, b1, w2, b2, w3, b3):
    # Pure f32 reference matching the PyTorch module semantics.
    h1 = jax.nn.sigmoid(x @ w1 + b1)
    h2 = jax.nn.sigmoid(h1 @ w2 + b2)
    return h2 @ w3 + b3


if __name__ == "__main__":
    key = jax.random.PRNGKey(0)
    k_x, k1, k2, k3 = jax.random.split(key, 4)

    B = 16                                # small batch for the smoke test
    x = jax.random.normal(k_x, (B, 784), jnp.float32)

    w1, b1 = init_linear_params(k1, 784, 256)
    w2, b2 = init_linear_params(k2, 256, 64)
    w3, b3 = init_linear_params(k3, 64, 10)

    out = simple_net_forward(x, w1, b1, w2, b2, w3, b3)
    out = jax.block_until_ready(out)

    ref = reference_forward(x, w1, b1, w2, b2, w3, b3)
    assert out.shape == (B, 10)
    # bf16 matmul operands with f32 accumulation -> loosened tolerance vs the f32 reference.
    assert jnp.allclose(out, ref, atol=2e-2, rtol=2e-2), "mismatch vs reference"

    print("KERNEL_OK")
</pallas_src>

<mosaic_0001>
module attributes {stable_mosaic.version = 11 : i64} {
  func.func @mlp_kernel(%arg0: i32, %arg1: memref<16x896xbf16, #tpu.memory_space<vmem>>, %arg2: memref<896x256xbf16, #tpu.memory_space<vmem>>, %arg3: memref<1x256xf32, #tpu.memory_space<vmem>>, %arg4: memref<256x64xbf16, #tpu.memory_space<vmem>>, %arg5: memref<1x64xf32, #tpu.memory_space<vmem>>, %arg6: memref<64x128xbf16, #tpu.memory_space<vmem>>, %arg7: memref<1x128xf32, #tpu.memory_space<vmem>>, %arg8: memref<16x128xf32, #tpu.memory_space<vmem>>) attributes {dimension_semantics = [#tpu.dimension_semantics<parallel>], iteration_bounds = array<i64: 1>, scalar_prefetch = 0 : i64, scratch_operands = 0 : i64, tpu.core_type = #tpu.core_type<tc>, window_params = [{transform_indices = @transform_0, window_bounds = array<i64: 16, 896>}, {pipeline_mode = #tpu.pipeline_mode<synchronous>, transform_indices = @transform_1, window_bounds = array<i64: 896, 256>}, {pipeline_mode = #tpu.pipeline_mode<synchronous>, transform_indices = @transform_2, window_bounds = array<i64: 1, 256>}, {pipeline_mode = #tpu.pipeline_mode<synchronous>, transform_indices = @transform_3, window_bounds = array<i64: 256, 64>}, {pipeline_mode = #tpu.pipeline_mode<synchronous>, transform_indices = @transform_4, window_bounds = array<i64: 1, 64>}, {pipeline_mode = #tpu.pipeline_mode<synchronous>, transform_indices = @transform_5, window_bounds = array<i64: 64, 128>}, {pipeline_mode = #tpu.pipeline_mode<synchronous>, transform_indices = @transform_6, window_bounds = array<i64: 1, 128>}, {transform_indices = @transform_7, window_bounds = array<i64: 16, 128>}]} {
    %c0 = arith.constant 0 : index
    %c0_0 = arith.constant 0 : index
    %0 = vector.load %arg1[%c0, %c0_0] : memref<16x896xbf16, #tpu.memory_space<vmem>>, vector<16x896xbf16>
    %c0_1 = arith.constant 0 : index
    %c0_2 = arith.constant 0 : index
    %1 = vector.load %arg2[%c0_1, %c0_2] : memref<896x256xbf16, #tpu.memory_space<vmem>>, vector<896x256xbf16>
    %cst = arith.constant dense<0.000000e+00> : vector<16x256xf32>
    %2 = tpu.matmul %0, %1, %cst {dimension_numbers = #tpu.dot_dimension_numbers<[1], [0], [0], [1], [0, 0, 1, 1], [], []>} : vector<16x896xbf16>, vector<896x256xbf16>, vector<16x256xf32> -> vector<16x256xf32>
    %c0_3 = arith.constant 0 : index
    %c0_4 = arith.constant 0 : index
    %3 = vector.load %arg3[%c0_3, %c0_4] : memref<1x256xf32, #tpu.memory_space<vmem>>, vector<1x256xf32>
    %4 = vector.broadcast %3 : vector<1x256xf32> to vector<16x256xf32>
    %5 = arith.addf %2, %4 : vector<16x256xf32>
    %6 = arith.negf %5 : vector<16x256xf32>
    %7 = math.exp %6 : vector<16x256xf32>
    %cst_5 = arith.constant 1.000000e+00 : f32
    %8 = vector.broadcast %cst_5 : f32 to vector<16x256xf32>
    %9 = arith.addf %8, %7 : vector<16x256xf32>
    %10 = arith.divf %8, %9 : vector<16x256xf32>
    %11 = arith.truncf %10 : vector<16x256xf32> to vector<16x256xbf16>
    %c0_6 = arith.constant 0 : index
    %c0_7 = arith.constant 0 : index
    %12 = vector.load %arg4[%c0_6, %c0_7] : memref<256x64xbf16, #tpu.memory_space<vmem>>, vector<256x64xbf16>
    %cst_8 = arith.constant dense<0.000000e+00> : vector<16x64xf32>
    %13 = tpu.matmul %11, %12, %cst_8 {dimension_numbers = #tpu.dot_dimension_numbers<[1], [0], [0], [1], [0, 0, 1, 1], [], []>} : vector<16x256xbf16>, vector<256x64xbf16>, vector<16x64xf32> -> vector<16x64xf32>
    %c0_9 = arith.constant 0 : index
    %c0_10 = arith.constant 0 : index
    %14 = vector.load %arg5[%c0_9, %c0_10] : memref<1x64xf32, #tpu.memory_space<vmem>>, vector<1x64xf32>
    %15 = vector.broadcast %14 : vector<1x64xf32> to vector<16x64xf32>
    %16 = arith.addf %13, %15 : vector<16x64xf32>
    %17 = arith.negf %16 : vector<16x64xf32>
    %18 = math.exp %17 : vector<16x64xf32>
    %cst_11 = arith.constant 1.000000e+00 : f32
    %19 = vector.broadcast %cst_11 : f32 to vector<16x64xf32>
    %20 = arith.addf %19, %18 : vector<16x64xf32>
    %21 = arith.divf %19, %20 : vector<16x64xf32>
    %22 = arith.truncf %21 : vector<16x64xf32> to vector<16x64xbf16>
    %c0_12 = arith.constant 0 : index
    %c0_13 = arith.constant 0 : index
    %23 = vector.load %arg6[%c0_12, %c0_13] : memref<64x128xbf16, #tpu.memory_space<vmem>>, vector<64x128xbf16>
    %cst_14 = arith.constant dense<0.000000e+00> : vector<16x128xf32>
    %24 = tpu.matmul %22, %23, %cst_14 {dimension_numbers = #tpu.dot_dimension_numbers<[1], [0], [0], [1], [0, 0, 1, 1], [], []>} : vector<16x64xbf16>, vector<64x128xbf16>, vector<16x128xf32> -> vector<16x128xf32>
    %c0_15 = arith.constant 0 : index
    %c0_16 = arith.constant 0 : index
    %25 = vector.load %arg7[%c0_15, %c0_16] : memref<1x128xf32, #tpu.memory_space<vmem>>, vector<1x128xf32>
    %26 = vector.broadcast %25 : vector<1x128xf32> to vector<16x128xf32>
    %27 = arith.addf %24, %26 : vector<16x128xf32>
    %c0_17 = arith.constant 0 : index
    %c0_18 = arith.constant 0 : index
    %28 = vector.load %arg8[%c0_17, %c0_18] : memref<16x128xf32, #tpu.memory_space<vmem>>, vector<16x128xf32>
    tpu.vector_store %arg8[%c0_17, %c0_18], %27 {strides = array<i32>} : memref<16x128xf32, #tpu.memory_space<vmem>>, vector<16x128xf32>,
    return
  }
  func.func @transform_0(%arg0: i32) -> (i32, i32) {
    %c0_i32 = arith.constant 0 : i32
    %c0_i32_0 = arith.constant 0 : i32
    return %arg0, %c0_i32 : i32, i32
  }
  func.func @transform_1(%arg0: i32) -> (i32, i32) {
    %c0_i32 = arith.constant 0 : i32
    %c0_i32_0 = arith.constant 0 : i32
    %c0_i32_1 = arith.constant 0 : i32
    return %c0_i32, %c0_i32_0 : i32, i32
  }
  func.func @transform_2(%arg0: i32) -> (i32, i32) {
    %c0_i32 = arith.constant 0 : i32
    %c0_i32_0 = arith.constant 0 : i32
    %c0_i32_1 = arith.constant 0 : i32
    return %c0_i32, %c0_i32_0 : i32, i32
  }
  func.func @transform_3(%arg0: i32) -> (i32, i32) {
    %c0_i32 = arith.constant 0 : i32
    %c0_i32_0 = arith.constant 0 : i32
    %c0_i32_1 = arith.constant 0 : i32
    return %c0_i32, %c0_i32_0 : i32, i32
  }
  func.func @transform_4(%arg0: i32) -> (i32, i32) {
    %c0_i32 = arith.constant 0 : i32
    %c0_i32_0 = arith.constant 0 : i32
    %c0_i32_1 = arith.constant 0 : i32
    return %c0_i32, %c0_i32_0 : i32, i32
  }
  func.func @transform_5(%arg0: i32) -> (i32, i32) {
    %c0_i32 = arith.constant 0 : i32
    %c0_i32_0 = arith.constant 0 : i32
    %c0_i32_1 = arith.constant 0 : i32
    return %c0_i32, %c0_i32_0 : i32, i32
  }
  func.func @transform_6(%arg0: i32) -> (i32, i32) {
    %c0_i32 = arith.constant 0 : i32
    %c0_i32_0 = arith.constant 0 : i32
    %c0_i32_1 = arith.constant 0 : i32
    return %c0_i32, %c0_i32_0 : i32, i32
  }
  func.func @transform_7(%arg0: i32) -> (i32, i32) {
    %c0_i32 = arith.constant 0 : i32
    %c0_i32_0 = arith.constant 0 : i32
    return %arg0, %c0_i32 : i32, i32
  }
}

</mosaic_0001>

<bundles_post_ra>
// kernel: simple_net_forward.1
= control target key start
LH: loop header
LB: loop body
LE: loop exit
PB: predicated region body
PF: predicated region fallthrough
CT: control target
= control target key end

     0   :  { %s2184_s0 = inlined_call_operand.vmem [shape: bf16[16,896], index: 0, kind: input, shape index: {}]   ;;  %s2185_s1 = inlined_call_operand.vmem [shape: bf16[896,256], index: 1, kind: input, shape index: {}]   ;;  %s2186_s2 = inlined_call_operand.vmem [shape: f32[1,256], index: 2, kind: input, shape index: {}]   ;;  %s2187_s3 = inlined_call_operand.vmem [shape: bf16[256,64], index: 3, kind: input, shape index: {}]   ;;  %s2188_s4 = inlined_call_operand.vmem [shape: f32[1,64], index: 4, kind: input, shape index: {}]   ;;  %s2189_s5 = inlined_call_operand.vmem [shape: bf16[64,128], index: 5, kind: input, shape index: {}]   ;;  %s2190_s6 = inlined_call_operand.vmem [shape: f32[1,128], index: 6, kind: input, shape index: {}]   ;;  %s2191_s7 = inlined_call_operand.hbm [shape: f32[16,128], index: 7, kind: output, shape index: {}]  }
   0x1   :  { %v1454_v0 = vld [vmem:[%s2185_s1 + $0x104] ss:$8 sps:$4 sm:$0xff]   ;;  %v1456_v1 = vld [vmem:[%s2185_s1 + $0x100] ss:$8 sps:$4 sm:$0xff]   ;;  %v1457_v2 = vld [vmem:[%s2185_s1 + $0x114] ss:$8 sps:$4 sm:$0xff]  }
   0x2   :  { %799 = vmatprep.subr.bf16.mxu0 %v1454_v0  ;;  %v1459_v3 = vld [vmem:[%s2185_s1 + $0x110] ss:$8 sps:$4 sm:$0xff]   ;;  %v1460_v4 = vld [vmem:[%s2185_s1 + $0x124] ss:$8 sps:$4 sm:$0xff]   ;;  %v1462_v5 = vld [vmem:[%s2185_s1 + $0x120] ss:$8 sps:$4 sm:$0xff]  }
   0x3   :  { %800 = vmatpush1.bf16.msra.mxu0 %v1456_v1  ;;  %v1463_v6 = vld [vmem:[%s2185_s1 + $0x134] ss:$8 sps:$4 sm:$0xff]   ;;  %v1465_v7 = vld [vmem:[%s2185_s1 + $0x130] ss:$8 sps:$4 sm:$0xff]   ;;  %v1478_v8 = vld [vmem:[%s2185_s1 + $0x4] ss:$8 sps:$4 sm:$0xff]  }
   0x4   :  { %801 = vmatprep.subr.bf16.mxu0 %v1457_v2  ;;  %v1480_v9 = vld [vmem:[%s2185_s1] ss:$8 sps:$4 sm:$0xff]   ;;  %v1466_v10 = vld [vmem:[%s2185_s1 + $0x144] ss:$8 sps:$4 sm:$0xff]   ;;  %756 = vmatprep.subr.bf16.mxu1 %v1478_v8  ;;  %v1484_v11 = vld [vmem:[%s2185_s1 + $0x14] ss:$8 sps:$4 sm:$0xff]  }
   0x5   :  { %757 = vmatpush1.bf16.msra.mxu1 %v1480_v9  ;;  %v1486_v12 = vld [vmem:[%s2185_s1 + $0x10] ss:$8 sps:$4 sm:$0xff]   ;;  %v1468_v13 = vld [vmem:[%s2185_s1 + $0x140] ss:$8 sps:$4 sm:$0xff]   ;;  %v1469_v14 = vld [vmem:[%s2185_s1 + $0x154] ss:$8 sps:$4 sm:$0xff]  }
   0x6   :  { %758 = vmatprep.subr.bf16.mxu1 %v1484_v11  ;;  %v1490_v15 = vld [vmem:[%s2185_s1 + $0x24] ss:$8 sps:$4 sm:$0xff]   ;;  %v1492_v16 = vld [vmem:[%s2185_s1 + $0x20] ss:$8 sps:$4 sm:$0xff]   ;;  %v1471_v17 = vld [vmem:[%s2185_s1 + $0x150] ss:$8 sps:$4 sm:$0xff]  }
   0x7   :  { %802 = vmatpush1.bf16.msra.mxu0 %v1459_v3  ;;  %v1496_v18 = vld [vmem:[%s2185_s1 + $0x34] ss:$8 sps:$4 sm:$0xff]   ;;  %v1472_v19 = vld [vmem:[%s2185_s1 + $0x164] ss:$8 sps:$4 sm:$0xff]   ;;  %v1498_v20 = vld [vmem:[%s2185_s1 + $0x30] ss:$8 sps:$4 sm:$0xff]  }
   0x8   :  { %803 = vmatprep.subr.bf16.mxu0 %v1460_v4  ;;  %v1474_v21 = vld [vmem:[%s2185_s1 + $0x160] ss:$8 sps:$4 sm:$0xff]   ;;  %v1502_v22 = vld [vmem:[%s2185_s1 + $0x44] ss:$8 sps:$4 sm:$0xff]   ;;  %v1475_v23 = vld [vmem:[%s2185_s1 + $0x174] ss:$8 sps:$4 sm:$0xff]  }
   0x9   :  { %759 = vmatpush1.bf16.msra.mxu1 %v1486_v12  ;;  %v1504_v24 = vld [vmem:[%s2185_s1 + $0x40] ss:$8 sps:$4 sm:$0xff]   ;;  %v1477_v25 = vld [vmem:[%s2185_s1 + $0x170] ss:$8 sps:$4 sm:$0xff]   ;;  %v1508_v26 = vld [vmem:[%s2185_s1 + $0x54] ss:$8 sps:$4 sm:$0xff]  }
   0xa   :  { %760 = vmatprep.subr.bf16.mxu1 %v1490_v15  ;;  %v1481_v27 = vld [vmem:[%s2185_s1 + $0x184] ss:$8 sps:$4 sm:$0xff]   ;;  %v1510_v28 = vld [vmem:[%s2185_s1 + $0x50] ss:$8 sps:$4 sm:$0xff]   ;;  %v1483_v29 = vld [vmem:[%s2185_s1 + $0x180] ss:$8 sps:$4 sm:$0xff]  }
   0xb   :  { %804 = vmatpush1.bf16.msra.mxu0 %v1462_v5  ;;  %v1514_v30 = vld [vmem:[%s2185_s1 + $0x64] ss:$8 sps:$4 sm:$0xff]   ;;  %v1487_v31 = vld [vmem:[%s2185_s1 + $0x194] ss:$8 sps:$4 sm:$0xff]   ;;  %v1516_v32 = vld [vmem:[%s2185_s1 + $0x60] ss:$8 sps:$4 sm:$0xff]  }
   0xc   :  { %805 = vmatprep.subr.bf16.mxu0 %v1463_v6  ;;  %v1531_v33 = vld [vmem:[%s2184_s0 + $0xc] ss:$28 sps:$4 sm:$0xff]   ;;  %v1489_v34 = vld [vmem:[%s2185_s1 + $0x190] ss:$8 sps:$4 sm:$0xff]   ;;  %v1520_v35 = vld [vmem:[%s2185_s1 + $0x74] ss:$8 sps:$4 sm:$0xff]  }
   0xd   :  { %761 = vmatpush1.bf16.msra.mxu1 %v1492_v16  ;;  %v1493_v36 = vld [vmem:[%s2185_s1 + $0x1a4] ss:$8 sps:$4 sm:$0xff]   ;;  %831 = vmatprep.mubr.bf16.mxu0 %v1531_v33  ;;  %v1522_v37 = vld [vmem:[%s2185_s1 + $0x70] ss:$8 sps:$4 sm:$0xff]   ;;  %v1495_v38 = vld [vmem:[%s2185_s1 + $0x1a0] ss:$8 sps:$4 sm:$0xff]  }
   0xe   :  { %762 = vmatprep.subr.bf16.mxu1 %v1496_v18  ;;  %v1526_v39 = vld [vmem:[%s2185_s1 + $0x84] ss:$8 sps:$4 sm:$0xff]   ;;  %v1499_v40 = vld [vmem:[%s2185_s1 + $0x1b4] ss:$8 sps:$4 sm:$0xff]   ;;  %v1528_v41 = vld [vmem:[%s2185_s1 + $0x80] ss:$8 sps:$4 sm:$0xff]  }
   0xf   :  { %806 = vmatpush1.bf16.msra.mxu0 %v1465_v7  ;;  %v1501_v42 = vld [vmem:[%s2185_s1 + $0x1b0] ss:$8 sps:$4 sm:$0xff]   ;;  %v1535_v43 = vld [vmem:[%s2185_s1 + $0x94] ss:$8 sps:$4 sm:$0xff]   ;;  %v1505_v44 = vld [vmem:[%s2185_s1 + $0x1c4] ss:$8 sps:$4 sm:$0xff]  }
  0x10   :  { %807 = vmatprep.subr.bf16.mxu0 %v1466_v10  ;;  %v1537_v45 = vld [vmem:[%s2185_s1 + $0x90] ss:$8 sps:$4 sm:$0xff]   ;;  %v1507_v46 = vld [vmem:[%s2185_s1 + $0x1c0] ss:$8 sps:$4 sm:$0xff]   ;;  %v1541_v47 = vld [vmem:[%s2185_s1 + $0xa4] ss:$8 sps:$4 sm:$0xff]  }
  0x11   :  { %763 = vmatpush1.bf16.msra.mxu1 %v1498_v20  ;;  %v1511_v48 = vld [vmem:[%s2185_s1 + $0x1d4] ss:$8 sps:$4 sm:$0xff]   ;;  %v1543_v49 = vld [vmem:[%s2185_s1 + $0xa0] ss:$8 sps:$4 sm:$0xff]   ;;  %v1513_v50 = vld [vmem:[%s2185_s1 + $0x1d0] ss:$8 sps:$4 sm:$0xff]  }
  0x12   :  { %764 = vmatprep.subr.bf16.mxu1 %v1502_v22  ;;  %v1547_v51 = vld [vmem:[%s2185_s1 + $0xb4] ss:$8 sps:$4 sm:$0xff]   ;;  %v1517_v52 = vld [vmem:[%s2185_s1 + $0x1e4] ss:$8 sps:$4 sm:$0xff]   ;;  %v1519_v53 = vld [vmem:[%s2185_s1 + $0x1e0] ss:$8 sps:$4 sm:$0xff]  }
  0x13   :  { %808 = vmatpush1.bf16.msra.mxu0 %v1468_v13  ;;  %v1549_v54 = vld [vmem:[%s2185_s1 + $0xb0] ss:$8 sps:$4 sm:$0xff]   ;;  %v1553_v55 = vld [vmem:[%s2185_s1 + $0xc4] ss:$8 sps:$4 sm:$0xff]   ;;  %v1523_v57 = vld [vmem:[%s2185_s1 + $0x1f4] ss:$8 sps:$4 sm:$0xff]  }
  0x14   :  { %809 = vmatprep.subr.bf16.mxu0 %v1469_v14  ;;  %v1579_v56 = vld [vmem:[%s2184_s0 + $0x4] ss:$28 sps:$4 sm:$0xff]   ;;  %v1525_v59 = vld [vmem:[%s2185_s1 + $0x1f0] ss:$8 sps:$4 sm:$0xff]   ;;  %v1559_v60 = vld [vmem:[%s2185_s1 + $0xd4] ss:$8 sps:$4 sm:$0xff]  }
  0x15   :  { %765 = vmatpush1.bf16.msra.mxu1 %v1504_v24  ;;  %788 = vmatprep.mubr.bf16.mxu1 %v1579_v56  ;;  %v1555_v58 = vld [vmem:[%s2185_s1 + $0xc0] ss:$8 sps:$4 sm:$0xff]   ;;  %v1534_v61 = vld [vmem:[%s2185_s1 + $0x204] ss:$8 sps:$4 sm:$0xff]   ;;  %v1561_v63 = vld [vmem:[%s2185_s1 + $0xd0] ss:$8 sps:$4 sm:$0xff]  }
  0x16   :  { %766 = vmatprep.subr.bf16.mxu1 %v1508_v26  ;;  %v1529_v62 = vld [vmem:[%s2184_s0 + $0x8] ss:$28 sps:$4 sm:$0xff]   ;;  %v1540_v2 = vld [vmem:[%s2185_s1 + $0x214] ss:$8 sps:$4 sm:$0xff]   ;;  %v1538_v4 = vld [vmem:[%s2185_s1 + $0x210] ss:$8 sps:$4 sm:$0xff]  }
  0x17   :  { %810 = vmatpush1.bf16.msra.mxu0 %v1471_v17  ;;  %v1532_v0 = vld [vmem:[%s2185_s1 + $0x200] ss:$8 sps:$4 sm:$0xff]   ;;  %v1565_v1 = vld [vmem:[%s2185_s1 + $0xe4] ss:$8 sps:$4 sm:$0xff]   ;;  %v1571_v5 = vld [vmem:[%s2185_s1 + $0xf4] ss:$8 sps:$4 sm:$0xff]  }
  0x18   :  { %811 = vmatprep.subr.bf16.mxu0 %v1472_v19  ;;  %v1567_v3 = vld [vmem:[%s2185_s1 + $0xe0] ss:$8 sps:$4 sm:$0xff]   ;;  %v1546_v6 = vld [vmem:[%s2185_s1 + $0x224] ss:$8 sps:$4 sm:$0xff]   ;;  %v1573_v7 = vld [vmem:[%s2185_s1 + $0xf0] ss:$8 sps:$4 sm:$0xff]  }
  0x19   :  { %767 = vmatpush1.bf16.msra.mxu1 %v1510_v28  ;;  %v1544_v8 = vld [vmem:[%s2185_s1 + $0x220] ss:$8 sps:$4 sm:$0xff]   ;;  %v1582_v9 = vld [vmem:[%s2185_s1 + $0x304] ss:$8 sps:$4 sm:$0xff]   ;;  %v1552_v10 = vld [vmem:[%s2185_s1 + $0x234] ss:$8 sps:$4 sm:$0xff]  }
  0x1a   :  { %768 = vmatprep.subr.bf16.mxu1 %v1514_v30  ;;  %v1577_v11 = vld [vmem:[%s2184_s0] ss:$28 sps:$4 sm:$0xff]   ;;  %v1550_v13 = vld [vmem:[%s2185_s1 + $0x230] ss:$8 sps:$4 sm:$0xff]   ;;  %v1558_v15 = vld [vmem:[%s2185_s1 + $0x244] ss:$8 sps:$4 sm:$0xff]  }
  0x1b   :  { %812 = vmatpush1.bf16.msra.mxu0 %v1474_v21  ;;  %v1580_v12 = vld [vmem:[%s2185_s1 + $0x300] ss:$8 sps:$4 sm:$0xff]   ;;  %v1588_v14 = vld [vmem:[%s2185_s1 + $0x314] ss:$8 sps:$4 sm:$0xff]   ;;  %v1586_v17 = vld [vmem:[%s2185_s1 + $0x310] ss:$8 sps:$4 sm:$0xff]  }
  0x1c   :  { %813 = vmatprep.subr.bf16.mxu0 %v1475_v23  ;;  %v1556_v16 = vld [vmem:[%s2185_s1 + $0x240] ss:$8 sps:$4 sm:$0xff]   ;;  %v1700_v18 = vmov 0   ;;  %v1630_v19 = vld [vmem:[%s2184_s0 + $0x14] ss:$28 sps:$4 sm:$0xff]  }
  0x1d   :  { %769 = vmatpush1.bf16.msra.mxu1 %v1516_v32  ;;  %v1564_v20 = vld [vmem:[%s2185_s1 + $0x254] ss:$8 sps:$4 sm:$0xff]   ;;  %v1594_v21 = vld [vmem:[%s2185_s1 + $0x324] ss:$8 sps:$4 sm:$0xff]   ;;  %v1592_v22 = vld [vmem:[%s2185_s1 + $0x320] ss:$8 sps:$4 sm:$0xff]  }
  0x1e   :  { %770 = vmatprep.subr.bf16.mxu1 %v1520_v35  ;;  %v1562_v23 = vld [vmem:[%s2185_s1 + $0x250] ss:$8 sps:$4 sm:$0xff]   ;;  %v1600_v24 = vld [vmem:[%s2185_s1 + $0x334] ss:$8 sps:$4 sm:$0xff]   ;;  %v1606_v28 = vld [vmem:[%s2185_s1 + $0x344] ss:$8 sps:$4 sm:$0xff]  }
  0x1f   :  { %814 = vmatpush1.bf16.msra.mxu0 %v1477_v25  ;;  %v1570_v25 = vld [vmem:[%s2185_s1 + $0x264] ss:$8 sps:$4 sm:$0xff]   ;;  %v1598_v26 = vld [vmem:[%s2185_s1 + $0x330] ss:$8 sps:$4 sm:$0xff]   ;;  %v1604_v30 = vld [vmem:[%s2185_s1 + $0x340] ss:$8 sps:$4 sm:$0xff]  }
  0x20   :  { %815 = vmatprep.subr.bf16.mxu0 %v1481_v27  ;;  %v1568_v27 = vld [vmem:[%s2185_s1 + $0x260] ss:$8 sps:$4 sm:$0xff]   ;;  %v1612_v32 = vld [vmem:[%s2185_s1 + $0x354] ss:$8 sps:$4 sm:$0xff]   ;;  %v1585_v33 = vld [vmem:[%s2185_s1 + $0x284] ss:$8 sps:$4 sm:$0xff]  }
  0x21   :  { %771 = vmatpush1.bf16.msra.mxu1 %v1522_v37 }
  0x22   :  { %772 = vmatprep.subr.bf16.mxu1 %v1526_v39 }
  0x23   :  { %816 = vmatpush1.bf16.msra.mxu0 %v1483_v29  ;;  %v1576_v29 = vld [vmem:[%s2185_s1 + $0x274] ss:$8 sps:$4 sm:$0xff]  }
  0x24   :  { %817 = vmatprep.subr.bf16.mxu0 %v1487_v31  ;;  %v1574_v31 = vld [vmem:[%s2185_s1 + $0x270] ss:$8 sps:$4 sm:$0xff]  }
  0x25   :  { %773 = vmatpush1.bf16.msra.mxu1 %v1528_v41 }
  0x26   :  { %774 = vmatprep.subr.bf16.mxu1 %v1535_v43 }
  0x27   :  { %818 = vmatpush1.bf16.msra.mxu0 %v1489_v34 }
  0x28   :  { %819 = vmatprep.subr.bf16.mxu0 %v1493_v36 }
  0x29   :  { %775 = vmatpush1.bf16.msra.mxu1 %v1537_v45 }
  0x2a   :  { %776 = vmatprep.subr.bf16.mxu1 %v1541_v47 }
  0x2b   :  { %820 = vmatpush1.bf16.msra.mxu0 %v1495_v38 }
  0x2c   :  { %821 = vmatprep.subr.bf16.mxu0 %v1499_v40 }
  0x2d   :  { %777 = vmatpush1.bf16.msra.mxu1 %v1543_v49 }
  0x2e   :  { %778 = vmatprep.subr.bf16.mxu1 %v1547_v51 }
  0x2f   :  { %822 = vmatpush1.bf16.msra.mxu0 %v1501_v42 }
  0x30   :  { %823 = vmatprep.subr.bf16.mxu0 %v1505_v44 }
  0x31   :  { %779 = vmatpush1.bf16.msra.mxu1 %v1549_v54 }
  0x32   :  { %780 = vmatprep.subr.bf16.mxu1 %v1553_v55 }
  0x33   :  { %824 = vmatpush1.bf16.msra.mxu0 %v1507_v46 }
  0x34   :  { %825 = vmatprep.subr.bf16.mxu0 %v1511_v48 }
  0x35   :  { %781 = vmatpush1.bf16.msra.mxu1 %v1555_v58 }
  0x36   :  { %782 = vmatprep.subr.bf16.mxu1 %v1559_v60 }
  0x37   :  { %826 = vmatpush1.bf16.msra.mxu0 %v1513_v50 }
  0x38   :  { %827 = vmatprep.subr.bf16.mxu0 %v1517_v52 }
  0x39   :  { %783 = vmatpush1.bf16.msra.mxu1 %v1561_v63 }
  0x3a   :  { %784 = vmatprep.subr.bf16.mxu1 %v1565_v1 }
  0x3b   :  { %828 = vmatpush1.bf16.msra.mxu0 %v1519_v53 }
  0x3c   :  { %829 = vmatprep.subr.bf16.mxu0 %v1523_v57 }
  0x3d   :  { %785 = vmatpush1.bf16.msra.mxu1 %v1567_v3 }
  0x3e   :  { %786 = vmatprep.subr.bf16.mxu1 %v1571_v5 }
  0x3f   :  { %830 = vmatpush1.bf16.msra.mxu0 %v1525_v59 }
  0x40   :  { %842 = vmatprep.subr.bf16.mxu0 %v1534_v61 }
  0x41   :  { %787 = vmatpush1.bf16.msra.mxu1 %v1573_v7 }
  0x42   :  { %832 = vmatmul.mubr.bf16.vlgmr.msra.gmra.mrb[0].mxu0 %v1529_v62  ;;  %885 = vmatprep.subr.bf16.mxu1 %v1582_v9 }
  0x43   :  { %843 = vmatpush1.bf16.msra.mxu0 %v1532_v0  ;;  %874 = vmatprep.mubr.bf16.mxu0 %v1630_v19 }
  0x44   :  { %844 = vmatprep.subr.bf16.mxu0 %v1540_v2  ;;  %789 = vmatmul.mubr.bf16.vlgmr.msra.gmra.mrb[0].mxu1 %v1577_v11 }
  0x45   :  { %886 = vmatpush1.bf16.msra.mxu1 %v1580_v12  ;;  %917 = vmatprep.mubr.bf16.mxu1 %v1700_v18 }
  0x46   :  { %887 = vmatprep.subr.bf16.mxu1 %v1588_v14 }
  0x47   :  { %845 = vmatpush1.bf16.msra.mxu0 %v1538_v4 }
  0x48   :  { %846 = vmatprep.subr.bf16.mxu0 %v1546_v6 }
  0x49   :  { %888 = vmatpush1.bf16.msra.mxu1 %v1586_v17 }
  0x4a   :  { %889 = vmatprep.subr.bf16.mxu1 %v1594_v21 }
  0x4b   :  { %847 = vmatpush1.bf16.msra.mxu0 %v1544_v8 }
  0x4c   :  { %848 = vmatprep.subr.bf16.mxu0 %v1552_v10 }
  0x4d   :  { %890 = vmatpush1.bf16.msra.mxu1 %v1592_v22 }
  0x4e   :  { %891 = vmatprep.subr.bf16.mxu1 %v1600_v24 }
  0x4f   :  { %849 = vmatpush1.bf16.msra.mxu0 %v1550_v13 }
  0x50   :  { %850 = vmatprep.subr.bf16.mxu0 %v1558_v15 }
  0x51   :  { %892 = vmatpush1.bf16.msra.mxu1 %v1598_v26 }
  0x52   :  { %893 = vmatprep.subr.bf16.mxu1 %v1606_v28 }
  0x53   :  { %851 = vmatpush1.bf16.msra.mxu0 %v1556_v16 }
  0x54   :  { %852 = vmatprep.subr.bf16.mxu0 %v1564_v20 }
  0x57   :  { %853 = vmatpush1.bf16.msra.mxu0 %v1562_v23 }
  0x58   :  { %854 = vmatprep.subr.bf16.mxu0 %v1570_v25 }
  0x5b   :  { %855 = vmatpush1.bf16.msra.mxu0 %v1568_v27 }
  0x5c   :  { %856 = vmatprep.subr.bf16.mxu0 %v1576_v29 }
  0x5d   :  { %12 = vsyncpa [#allocation3], 0  ;;  %894 = vmatpush1.bf16.msra.mxu1 %v1604_v30  ;;  %v1610_v34 = vld [vmem:[%s2185_s1 + $0x350] ss:$8 sps:$4 sm:$0xff]   ;;  %v1583_v35 = vld [vmem:[%s2185_s1 + $0x280] ss:$8 sps:$4 sm:$0xff]   ;;  %v150_v16 = vlaneseq }
  0x5e   :  { %895 = vmatprep.subr.bf16.mxu1 %v1612_v32  ;;  %v1618_v36 = vld [vmem:[%s2185_s1 + $0x364] ss:$8 sps:$4 sm:$0xff]   ;;  %v1591_v37 = vld [vmem:[%s2185_s1 + $0x294] ss:$8 sps:$4 sm:$0xff]   ;;  %v1616_v38 = vld [vmem:[%s2185_s1 + $0x360] ss:$8 sps:$4 sm:$0xff]  }
  0x5f   :  { %857 = vmatpush1.bf16.msra.mxu0 %v1574_v31  ;;  %v1589_v39 = vld [vmem:[%s2185_s1 + $0x290] ss:$8 sps:$4 sm:$0xff]   ;;  %v1624_v40 = vld [vmem:[%s2185_s1 + $0x374] ss:$8 sps:$4 sm:$0xff]   ;;  %v1597_v41 = vld [vmem:[%s2185_s1 + $0x2a4] ss:$8 sps:$4 sm:$0xff]  }
  0x60   :  { %858 = vmatprep.subr.bf16.mxu0 %v1585_v33  ;;  %v1622_v42 = vld [vmem:[%s2185_s1 + $0x370] ss:$8 sps:$4 sm:$0xff]   ;;  %v1595_v43 = vld [vmem:[%s2185_s1 + $0x2a0] ss:$8 sps:$4 sm:$0xff]   ;;  %v1603_v44 = vld [vmem:[%s2185_s1 + $0x2b4] ss:$8 sps:$4 sm:$0xff]  }
  0x61   :  { %896 = vmatpush1.bf16.msra.mxu1 %v1610_v34  ;;  %v1631_v45 = vld [vmem:[%s2184_s0 + $0x18] ss:$28 sps:$4 sm:$0xff]   ;;  %v1609_v47 = vld [vmem:[%s2185_s1 + $0x2c4] ss:$8 sps:$4 sm:$0xff]   ;;  %v1607_v48 = vld [vmem:[%s2185_s1 + $0x2c0] ss:$8 sps:$4 sm:$0xff]  }
  0x62   :  { %897 = vmatprep.subr.bf16.mxu1 %v1618_v36  ;;  %v1601_v46 = vld [vmem:[%s2185_s1 + $0x2b0] ss:$8 sps:$4 sm:$0xff]   ;;  %v1615_v49 = vld [vmem:[%s2185_s1 + $0x2d4] ss:$8 sps:$4 sm:$0xff]   ;;  %v1621_v51 = vld [vmem:[%s2185_s1 + $0x2e4] ss:$8 sps:$4 sm:$0xff]  }
  0x63   :  { %859 = vmatpush1.bf16.msra.mxu0 %v1583_v35  ;;  %v1613_v50 = vld [vmem:[%s2185_s1 + $0x2d0] ss:$8 sps:$4 sm:$0xff]   ;;  %v1619_v52 = vld [vmem:[%s2185_s1 + $0x2e0] ss:$8 sps:$4 sm:$0xff]   ;;  %v1627_v53 = vld [vmem:[%s2185_s1 + $0x2f4] ss:$8 sps:$4 sm:$0xff]  }
  0x64   :  { %860 = vmatprep.subr.bf16.mxu0 %v1591_v37  ;;  %v1625_v54 = vld [vmem:[%s2185_s1 + $0x2f0] ss:$8 sps:$4 sm:$0xff]   ;;  %v1632_v56 = vld [vmem:[%s2187_s3 + $0x40] sm:$0xff]   ;;  %v1634_v58 = vld [vmem:[%s2187_s3 + $0x48] sm:$0xff]   ;;  %v151_v17 = vshrl.u32 %v150_v16, 7  ;;  %vm1702_vm0 = vmmov 0  }
  0x65   :  { %898 = vmatpush1.bf16.msra.mxu1 %v1616_v38  ;;  %v1628_v55 = vld [vmem:[%s2184_s0 + $0x10] ss:$28 sps:$4 sm:$0xff]   ;;  %v1633_v57 = vld [vmem:[%s2187_s3] sm:$0xff]   ;;  %v1638_v62 = vld [vmem:[%s2187_s3 + $0x58] sm:$0xff]   ;;  %vm1182_vm1 = vcmask 523264   ;;  %s1703_s24 = smov [#allocation2]  }
  0x66   :  { %899 = vmatprep.subr.bf16.mxu1 %v1624_v40  ;;  %v1635_v59 = vld [vmem:[%s2187_s3 + $0x8] sm:$0xff]   ;;  %v1636_v60 = vld [vmem:[%s2187_s3 + $0x50] sm:$0xff]   ;;  %v1639_v63 = vld [vmem:[%s2187_s3 + $0x18] sm:$0xff]   ;;  %v152_v18 = vsub.s32 0, %v151_v17  ;;  %v156_v20 = vsub.s32 1, %v151_v17  ;;  %s1234_s25 = sshll.u32 %s1703_s24, 4  ;;  %s1235_s25 = int_to_ptr.vmem [resolvable:$true] %s1234_s25 }
  0x67   :  { %861 = vmatpush1.bf16.msra.mxu0 %v1589_v39  ;;  %v1637_v61 = vld [vmem:[%s2187_s3 + $0x10] sm:$0xff]   ;;  %v1640_v0 = vld [vmem:[%s2187_s3 + $0x60] sm:$0xff]   ;;  %v1642_v2 = vld [vmem:[%s2187_s3 + $0x68] sm:$0xff]   ;;  %s1676_s26 = scalar_lea.vmem %s1235_s25, 256  ;;  %p1681_p1 = scmp.lt.s32.totalorder %s1235_s25, %s1235_s25 }
  0x68   :  { %862 = vmatprep.subr.bf16.mxu0 %v1597_v41  ;;  %v1641_v1 = vld [vmem:[%s2187_s3 + $0x20] sm:$0xff]   ;;  %v1643_v3 = vld [vmem:[%s2187_s3 + $0x28] sm:$0xff]   ;;  %v1644_v4 = vld [vmem:[%s2187_s3 + $0x70] sm:$0xff]   ;;  %p1677_p0 = scmp.ne.s32.totalorder %s1235_s25, %s1676_s26  ;;  %p1682_p2 = scmp.lt.s32.totalorder %s1676_s26, %s1676_s26 }
  0x69   :  { %900 = vmatpush1.bf16.msra.mxu1 %v1622_v42  ;;  %v1645_v5 = vld [vmem:[%s2187_s3 + $0x30] sm:$0xff]   ;;  %v1646_v6 = vld [vmem:[%s2187_s3 + $0x78] sm:$0xff]   ;;  %v148_v19 = vld [vmem:[%s2186_s2] sm:$0x3] }
  0x6a   :  { %1393 = vmatprep.subr.bf16.mxu1 %v1632_v56  ;;  %v1647_v7 = vld [vmem:[%s2187_s3 + $0x38] sm:$0xff]   ;;  %v153_v21 = vrot.slane %v148_v19, %v152_v18  ;;  %v157_v22 = vrot.slane %v148_v19, %v156_v20  ;;  %v1387_v16 = vld [vmem:[%s2190_s6] ss:$0 sm:$0xff]  ;;  %p1683_p3 = por %p1682_p2, %p1681_p1 }
  0x6b   :  { %863 = vmatpush1.bf16.msra.mxu0 %v1595_v43 }
  0x6c   :  { %864 = vmatprep.subr.bf16.mxu0 %v1603_v44  ;;  %918 = vmatmul.mubr.bf16.vlgmr.msra.gmra.mrb[4].mxu1 %v1631_v45  ;;  %p1684_p4 = pnand %p1683_p3, %p1677_p0 }
  0x6d   :  { %1394 = vmatpush3.bf16.msra.mxu1 %v1633_v57  ;;  %v1648_v57 = vld [vmem:[%s2189_s5] sm:$0xff]  }
  0x6e   :  { %1395 = vmatprep.subr.bf16.mxu1 %v1634_v58  ;;  %v1701_v58 = vmov 0.0  }
  0x6f   :  { %865 = vmatpush1.bf16.msra.mxu0 %v1601_v46 }
  0x70   :  { %866 = vmatprep.subr.bf16.mxu0 %v1609_v47 }
  0x71   :  { %1396 = vmatpush3.bf16.msra.mxu1 %v1635_v59  ;;  %v1649_v59 = vld [vmem:[%s2189_s5 + $0x8] sm:$0xff]  }
  0x72   :  { %1397 = vmatprep.subr.bf16.mxu1 %v1636_v60  ;;  %v1650_v60 = vld [vmem:[%s2189_s5 + $0x10] sm:$0xff]  }
  0x73   :  { %867 = vmatpush1.bf16.msra.mxu0 %v1607_v48 }
  0x74   :  { %868 = vmatprep.subr.bf16.mxu0 %v1615_v49 }
  0x75   :  { %1398 = vmatpush3.bf16.msra.mxu1 %v1637_v61  ;;  %v1651_v61 = vld [vmem:[%s2189_s5 + $0x18] sm:$0xff]  }
  0x76   :  { %1399 = vmatprep.subr.bf16.mxu1 %v1638_v62 }
  0x77   :  { %869 = vmatpush1.bf16.msra.mxu0 %v1613_v50 }
  0x78   :  { %870 = vmatprep.subr.bf16.mxu0 %v1621_v51 }
  0x79   :  { %1400 = vmatpush3.bf16.msra.mxu1 %v1639_v63  ;;  %v1368_v63 = vld [vmem:[%s2188_s4] ss:$0 sm:$0xff] }
  0x7a   :  { %1401 = vmatprep.subr.bf16.mxu1 %v1640_v0 }
  0x7b   :  { %871 = vmatpush1.bf16.msra.mxu0 %v1619_v52 }
  0x7c   :  { %872 = vmatprep.subr.bf16.mxu0 %v1627_v53 }
  0x7d   :  { %1402 = vmatpush3.bf16.msra.mxu1 %v1641_v1 }
  0x7e   :  { %1403 = vmatprep.subr.bf16.mxu1 %v1642_v2 }
  0x7f   :  { %873 = vmatpush1.bf16.msra.mxu0 %v1625_v54 }
  0x81   :  { %1404 = vmatpush3.bf16.msra.mxu1 %v1643_v3 }
  0x82   :  { %875 = vmatmul.mubr.bf16.vlgmr.msra.gmra.mrb[0].mxu0 %v1628_v55  ;;  %1405 = vmatprep.subr.bf16.mxu1 %v1644_v4 }
  0x85   :  { %1406 = vmatpush3.bf16.msra.mxu1 %v1645_v5 }
  0x86   :  { %1407 = vmatprep.subr.bf16.mxu1 %v1646_v6 }
  0x89   :  { %1408 = vmatpush3.bf16.msra.mxu1 %v1647_v7 }
  0x8a   :  { %1420 = vmatprep.subr.bf16.mxu1 %v1701_v58 }
 0x117   :  { %v790_v8 = vpop.f32.mrb[0].mxu1 }
 0x118   :  { %v792_v9 = vpop.f32.mrb[1].mxu1  ;;  %v791_v23 = vadd.f32 %v790_v8, %v153_v21 }
 0x119   :  { %v794_v10 = vpop.f32.mrb[2].mxu1  ;;  %v793_v24 = vadd.f32 %v792_v9, %v157_v22 }
 0x11a   :  { %v796_v11 = vpop.f32.mrb[3].mxu1  ;;  %v795_v26 = vadd.f32 %v794_v10, %v153_v21 }
 0x11b   :  { %v797_v29 = vadd.f32 %v796_v11, %v157_v22 }
 0x13f   :  { %v919_v12 = vpop.f32.mrb[4].mxu1 }
 0x140   :  { %v921_v13 = vpop.f32.mrb[5].mxu1 }
 0x141   :  { %v923_v14 = vpop.f32.mrb[6].mxu1 }
 0x142   :  { %v925_v15 = vpop.f32.mrb[7].mxu1 }
 0x155   :  { %v876_v25 = vpop.f32.mrb[0].mxu0 }
 0x156   :  { %v1433_v27 = vadd.f32 %v876_v25, %v791_v23  ;;  %v878_v28 = vpop.f32.mrb[1].mxu0 }
 0x157   :  { %v1436_v30 = vadd.f32 %v878_v28, %v793_v24  ;;  %v880_v31 = vpop.f32.mrb[2].mxu0 }
 0x158   :  { %v1434_v32 = vadd.f32 %v1433_v27, %v919_v12  ;;  %v1439_v33 = vadd.f32 %v880_v31, %v795_v26  ;;  %v882_v34 = vpop.f32.mrb[3].mxu0 }
 0x159   :  { %v1437_v35 = vadd.f32 %v1436_v30, %v921_v13  ;;  %v1442_v36 = vadd.f32 %v882_v34, %v797_v29 }
 0x15a   :  { %v1364_v37 = vmul.f32 -1.442695, %v1434_v32  ;;  %v1440_v38 = vadd.f32 %v1439_v33, %v923_v14 }
 0x15b   :  { %v1365_v39 = vmul.f32 -1.442695, %v1437_v35  ;;  %v1443_v40 = vadd.f32 %v1442_v36, %v925_v15 }
 0x15c   :  { %1652 = vpow2.f32 %v1364_v37  ;;  %v1366_v41 = vmul.f32 -1.442695, %v1440_v38 }
 0x15d   :  { %1654 = vpow2.f32 %v1365_v39  ;;  %v1367_v42 = vmul.f32 -1.442695, %v1443_v40 }
 0x15e   :  { %1656 = vpow2.f32 %v1366_v41 }
 0x15f   :  { %1658 = vpow2.f32 %v1367_v42 }
 0x166   :  { %v1653_v43 = vpop.eup %1652 }
 0x167   :  { %v1655_v44 = vpop.eup %1654  ;;  %v940_v45 = vadd.f32 1.0, %v1653_v43 }
 0x168   :  { %v1657_v46 = vpop.eup %1656  ;;  %v941_v47 = vadd.f32 1.0, %v1655_v44 }
 0x169   :  { %v1659_v48 = vpop.eup %1658  ;;  %1660 = vrcp.f32 %v940_v45  ;;  %v942_v49 = vadd.f32 1.0, %v1657_v46 }
 0x16a   :  { %1662 = vrcp.f32 %v941_v47  ;;  %v943_v50 = vadd.f32 1.0, %v1659_v48 }
 0x16b   :  { %1664 = vrcp.f32 %v942_v49 }
 0x16c   :  { %1666 = vrcp.f32 %v943_v50 }
 0x173   :  { %v1661_v51 = vpop.eup %1660 }
 0x174   :  { %v1663_v52 = vpop.eup %1662 }
 0x175   :  { %v1665_v53 = vpop.eup %1664 }
 0x176   :  { %v1667_v54 = vpop.eup %1666  ;;  %v952_v55 = vpack.c.bf16 %v1665_v53, %v1661_v51 }
 0x177   :  { %v953_v56 = vpack.c.bf16 %v1667_v54, %v1663_v52 }
 0x179   :  { %1121 = vmatprep.mubr.bf16.mxu1 %v953_v56 }
 0x17a   :  { %1122 = vmatmul.mubr.bf16.vlgmr.msra.gmra.mrb[8].mxu1 %v952_v55 }
 0x17b   :  { %1421 = vmatpush3.bf16.msra.mxu1 %v1648_v57  ;;  %1428 = vmatprep.mubr.msk.bf16.mxu1 %vm1702_vm0, %v1701_v58 }
 0x17c   :  { %1422 = vmatprep.subr.bf16.mxu1 %v1701_v58 }
 0x17f   :  { %1423 = vmatpush3.bf16.msra.mxu1 %v1649_v59 }
 0x180   :  { %1424 = vmatprep.subr.bf16.mxu1 %v1701_v58 }
 0x183   :  { %1425 = vmatpush3.bf16.msra.mxu1 %v1650_v60 }
 0x184   :  { %1426 = vmatprep.subr.bf16.mxu1 %v1701_v58 }
 0x187   :  { %1427 = vmatpush3.bf16.msra.mxu1 %v1651_v61 }
 0x24d   :  { %v1409_v62 = vpop.f32.mrb[8].mxu1 }
 0x24e   :  { %v1410_v0 = vpop.f32.mrb[9].mxu1 }
 0x24f   :  { %v1411_v1 = vadd.f32 %v1410_v0, %v1409_v62  ;;  %v1412_v2 = vpop.f32.mrb[10].mxu1 }
 0x250   :  { %v1413_v3 = vpop.f32.mrb[11].mxu1 }
 0x251   :  { %v1124_v4 = vadd.f32 %v1411_v1, %v1368_v63  ;;  %v1414_v5 = vadd.f32 %v1413_v3, %v1412_v2 }
 0x253   :  { %v1385_v6 = vmul.f32 -1.442695, %v1124_v4  ;;  %v1127_v7 = vadd.f32 %v1414_v5, %v1368_v63 }
 0x255   :  { %1668 = vpow2.f32 %v1385_v6  ;;  %v1386_v8 = vmul.f32 -1.442695, %v1127_v7 }
 0x257   :  { %1670 = vpow2.f32 %v1386_v8 }
 0x25f   :  { %v1669_v9 = vpop.eup %1668 }
 0x260   :  { %v1136_v10 = vadd.f32 1.0, %v1669_v9 }
 0x261   :  { %v1671_v11 = vpop.eup %1670 }
 0x262   :  { %v1137_v12 = vadd.f32 1.0, %v1671_v11  ;;  %1672 = vrcp.f32 %v1136_v10 }
 0x264   :  { %1674 = vrcp.f32 %v1137_v12 }
 0x26c   :  { %v1673_v13 = vpop.eup %1672 }
 0x26e   :  { %v1675_v14 = vpop.eup %1674 }
 0x26f   :  { %v1142_v15 = vpack.c.bf16 %v1675_v14, %v1673_v13 }
 0x271   :  { %1429 = vmatmul.mubr.msk.bf16.vlgmr.msra.gmra.mrb[12].mxu1 %vm1182_vm1, %v1142_v15 }
 0x344   :  { %v1220_v17 = vpop.f32.mrb[12].mxu1 }
 0x345   :  { %v1221_v18 = vadd.f32 %v1387_v16, %v1220_v17  ;;  %v1430_v19 = vpop.f32.mrb[13].mxu1 }
 0x346   :  { %v1223_v20 = vpop.f32.mrb[14].mxu1 }
 0x347   :  { %1227 = vst [vmem:[#allocation2] sm:$0xff] %v1221_v18  ;;  %v1224_v21 = vadd.f32 %v1387_v16, %v1223_v20  ;;  %v1431_v22 = vpop.f32.mrb[15].mxu1 }
 0x349   :  { %1228 = vst [vmem:[#allocation2 + $0x8] sm:$0xff] %v1224_v21 }
 0x34a   :  { %1687 = shalt.err (!%p1684_p4)
}
 0x34b   :  { %s1688_s28 = scalar_lea.hbm %s2191_s7, 256 }
 0x34c   :  { %p1689_p5 = scmp.ne.s32.totalorder %s2191_s7, %s1688_s28  ;;  %p1692_p6 = scmp.lt.u32.totalorder %s1688_s28, %s2191_s7 }
 0x34e   :  { %p1694_p7 = pnand %p1692_p6, %p1689_p5 }
 0x350   :  { %1697 = shalt.err (!%p1694_p7)
}
 0x351   :  { %s1704_s10 = smov 128   ;;  %s1705_s11 = smov 8  }
 0x352   :  { %1240 = dma.vmem_to_hbm [thread:$0]  %s1235_s25, 256, %s2191_s7, [#allocation3], %s1704_s10, %s1704_s10, %s1705_s11  }
 0x353   :  { %1698 = dma.done.wait [#allocation3], 256  }
 0x354   :  { %1699 = vsyncadd [#allocation3], 4294967040 }
 0x355   :  { %1244 = vsyncpa [#allocation3], 1 }

</bundles_post_ra>
